<compile_context>
chip_gen: v7x
topology: tpu7x:2x2x1
jax: 0.10.0
libtpu: 0.0.40
codegen_flags: <defaults>
</compile_context>

<pallas_src>
import functools
import math

import jax
import jax.numpy as jnp
from jax.experimental import pallas as pl
from jax.experimental.pallas import tpu as pltpu


def _encoder_kernel(x_ref, w_ref, ef_ref, o_ref, *, n_heads, inner_dim):
    """One grid step = (one batch row block) x (one layer).

    x_ref : (N, dim)        this batch's input rows (DMA'd once per batch).
    w_ref : (L, 3, dim, hd) ALL layers' Wq/Wk/Wv, pre-transposed so x @ W works
                            directly; resident in VMEM for the whole kernel.
    ef_ref: (L, 2, kp, N)   ALL layers' Linformer E/F (already sliced to the
                            actual sequence length); resident in VMEM.
    o_ref : (N, hd)         output block for this batch.  Its BlockSpec index
                            is constant along the layer axis, so it stays
                            resident in VMEM and carries activations between
                            layers (no scratch buffer, no final copy).
    """
    layer = pl.program_id(1)
    H, d = n_heads, inner_dim
    seq = x_ref.shape[0]
    scale = 1.0 / math.sqrt(d)

    # Layer 0: the carry starts life as the kernel input.
    @pl.when(layer == 0)
    def _():
        o_ref[...] = x_ref[...]

    x = o_ref[...]                                              # (N, dim) carry

    w = w_ref[layer]                                            # (3, dim, hd)
    wq, wk, wv = w[0], w[1], w[2]
    ef = ef_ref[layer]                                          # (2, kp, N)
    e, f = ef[0], ef[1]

    # QKV: three full-width MXU dots (no lane-slicing of a fused output).
    q = jnp.dot(x, wq, preferred_element_type=jnp.float32)      # (N, hd)
    k = jnp.dot(x, wk, preferred_element_type=jnp.float32)      # (N, hd)
    v = jnp.dot(x, wv, preferred_element_type=jnp.float32)      # (N, hd)

    # Linformer sequence compression, fused across all heads.
    k_p = jnp.dot(e, k, preferred_element_type=jnp.float32)     # (kp, hd)
    v_p = jnp.dot(f, v, preferred_element_type=jnp.float32)     # (kp, hd)

    # Head-batched attention: one reshape up front, head = dot_general batch
    # dim.  Replaces the old per-head python loop + lane-axis concatenations.
    qh = q.reshape(seq, H, d)                                   # (N, H, d)
    kh = k_p.reshape(-1, H, d)                                  # (kp, H, d)
    vh = v_p.reshape(-1, H, d)                                  # (kp, H, d)

    s = jnp.einsum('nhd,khd->hnk', qh, kh,
                   preferred_element_type=jnp.float32) * scale  # (H, N, kp)
    s = s - jnp.max(s, axis=-1, keepdims=True)
    p = jnp.exp(s)
    p = p * pl.reciprocal(jnp.sum(p, axis=-1, keepdims=True), approx=True)
    out = jnp.einsum('hnk,khd->nhd', p, vh,
                     preferred_element_type=jnp.float32)        # (N, H, d)

    # hd == dim, so the attention output feeds the next layer directly
    # (out_proj skipped, matching the PyTorch branch).
    o_ref[...] = out.reshape(seq, H * d).astype(o_ref.dtype)


def transformer_encoder(x, layer_params, *, n_heads, inner_dim):
    """x: (B, N, dim) float32.
    layer_params: list of (w_qkv (3*h*d, dim), e_w (kp, max_len), f_w (kp, max_len)),
    one tuple per stacked layer (Replicated semantics).
    Returns (B, N, n_heads*inner_dim)."""
    B, N, dim = x.shape
    hd = n_heads * inner_dim
    assert hd == dim, "out_proj is only skipped when inner_dim * n_heads == dim"
    n_layers = len(layer_params)
    kp = layer_params[0][1].shape[0]

    # One-time wrapper-side layout plumbing (outside the kernel):
    #   split the fused (3*hd, dim) qkv weight into per-projection, pre-
    #   transposed (dim, hd) matrices; slice E/F to the actual key length and
    #   stack them so the kernel gets one resident block each.
    w_stack = jnp.stack([
        jnp.stack([w[0:hd].T, w[hd:2 * hd].T, w[2 * hd:3 * hd].T])
        for (w, _, _) in layer_params])                          # (L, 3, dim, hd)
    ef_stack = jnp.stack([
        jnp.stack([e[:, :N], f[:, :N]])
        for (_, e, f) in layer_params])                          # (L, 2, kp, N)

    kernel = functools.partial(_encoder_kernel,
                               n_heads=n_heads, inner_dim=inner_dim)

    out = pl.pallas_call(
        kernel,
        out_shape=jax.ShapeDtypeStruct((B, N, hd), x.dtype),
        grid_spec=pltpu.PrefetchScalarGridSpec(
            num_scalar_prefetch=0,
            grid=(B, n_layers),
            in_specs=[
                # Per-batch input rows (re-DMA'd only when b changes).
                pl.BlockSpec((None, N, dim), lambda b, l: (b, 0, 0)),
                # Whole weight stack, resident for the full kernel.
                pl.BlockSpec((n_layers, 3, dim, hd), lambda b, l: (0, 0, 0, 0)),
                # Whole E/F stack, resident (one 2 KiB DMA instead of 2*L tiny ones).
                pl.BlockSpec((n_layers, 2, kp, N), lambda b, l: (0, 0, 0, 0)),
            ],
            # Output block constant along the layer axis -> resident carry.
            out_specs=pl.BlockSpec((None, N, hd), lambda b, l: (b, 0, 0)),
        ),
        compiler_params=pltpu.CompilerParams(
            # Batches are independent (megacore-shardable on v7x); layers are
            # sequentially dependent.
            dimension_semantics=("parallel", "arbitrary")),
    )(x, w_stack, ef_stack)

    return out


def _reference_layer(x, w_qkv, e_w, f_w, *, n_heads, inner_dim):
    """Plain-JAX reference reproducing one LinformerAttention forward."""
    B, N, dim = x.shape
    hd = n_heads * inner_dim
    qkv = x @ w_qkv.T                                 # (B, N, 3*hd)
    q, k, v = jnp.split(qkv, 3, axis=-1)

    def to_bhnd(t):
        return jnp.transpose(t.reshape(B, N, n_heads, inner_dim), (0, 2, 1, 3))

    q, k, v = map(to_bhnd, (q, k, v))                 # (B, H, N, d)
    proj_k = e_w[:, :N]
    proj_v = f_w[:, :N]
    k = jnp.einsum("kn,bhnd->bhkd", proj_k, k)
    v = jnp.einsum("kn,bhnd->bhkd", proj_v, v)
    s = jnp.einsum("bhnd,bhkd->bhnk", q, k) / math.sqrt(inner_dim)
    p = jax.nn.softmax(s, axis=-1)
    o = jnp.einsum("bhnk,bhkd->bhnd", p, v)
    return jnp.transpose(o, (0, 2, 1, 3)).reshape(B, N, hd)


def _reference(x, layer_params, *, n_heads, inner_dim):
    for (w, e, f) in layer_params:
        x = _reference_layer(x, w, e, f, n_heads=n_heads, inner_dim=inner_dim)
    return x


if __name__ == "__main__":
    # Module config: dim=32, n_heads=4 -> inner_dim=8, k=8, seq len 16, 2 layers.
    B, N, DIM = 2, 16, 32
    N_HEADS = 4
    INNER_DIM = DIM // N_HEADS        # 8  (so out_proj is not applied)
    K_PROJ = 8
    MAX_LEN = 16
    N_LAYERS = 2

    key = jax.random.PRNGKey(0)
    k_x, key = jax.random.split(key)
    x = jax.random.normal(k_x, (B, N, DIM), dtype=jnp.float32)

    # Deterministic synthetic parameters, independent per layer (Replicated
    # deep-copies + reset_parameters, so each stacked layer has its own weights).
    layer_params = []
    for _ in range(N_LAYERS):
        k_qkv, k_e, k_f, key = jax.random.split(key, 4)
        w_qkv = jax.random.normal(
            k_qkv, (3 * N_HEADS * INNER_DIM, DIM),
            dtype=jnp.float32) * (1.0 / math.sqrt(DIM))
        e_w = jax.random.normal(
            k_e, (K_PROJ, MAX_LEN), dtype=jnp.float32) * (1.0 / math.sqrt(MAX_LEN))
        f_w = jax.random.normal(
            k_f, (K_PROJ, MAX_LEN), dtype=jnp.float32) * (1.0 / math.sqrt(MAX_LEN))
        layer_params.append((w_qkv, e_w, f_w))

    out = transformer_encoder(x, layer_params, n_heads=N_HEADS, inner_dim=INNER_DIM)
    out = jax.block_until_ready(out)

    ref = _reference(x, layer_params, n_heads=N_HEADS, inner_dim=INNER_DIM)
    assert out.shape == (B, N, DIM), out.shape
    # Tolerance loosened slightly because of the approximate (EUP) reciprocal
    # used for the softmax normalization.
    assert jnp.allclose(out, ref, atol=5e-3, rtol=5e-3), (
        "mismatch vs reference, max abs diff = %f"
        % float(jnp.max(jnp.abs(out - ref))))

    print("KERNEL_OK")
</pallas_src>

<mosaic_0001>
module attributes {stable_mosaic.version = 11 : i64} {
  func.func @_encoder_kernel(%arg0: i32, %arg1: i32, %arg2: memref<1x16x32xf32, #tpu.memory_space<vmem>>, %arg3: memref<2x3x32x32xf32, #tpu.memory_space<vmem>>, %arg4: memref<2x2x8x16xf32, #tpu.memory_space<vmem>>, %arg5: memref<1x16x32xf32, #tpu.memory_space<vmem>>) attributes {dimension_semantics = [#tpu.dimension_semantics<parallel>, #tpu.dimension_semantics<arbitrary>], iteration_bounds = array<i64: 2, 2>, scalar_prefetch = 0 : i64, scratch_operands = 0 : i64, tpu.core_type = #tpu.core_type<tc>, window_params = [{transform_indices = @transform_0, window_bounds = array<i64: 1, 16, 32>}, {pipeline_mode = #tpu.pipeline_mode<synchronous>, transform_indices = @transform_1, window_bounds = array<i64: 2, 3, 32, 32>}, {pipeline_mode = #tpu.pipeline_mode<synchronous>, transform_indices = @transform_2, window_bounds = array<i64: 2, 2, 8, 16>}, {transform_indices = @transform_3, window_bounds = array<i64: 1, 16, 32>}]} {
    %c0_i32 = arith.constant 0 : i32
    %0 = arith.cmpi eq, %arg1, %c0_i32 : i32
    %1 = arith.extui %0 : i1 to i32
    %c0_i32_0 = arith.constant 0 : i32
    %2 = arith.cmpi ne, %1, %c0_i32_0 : i32
    scf.if %2 {
      %c0_21 = arith.constant 0 : index
      %c0_22 = arith.constant 0 : index
      %c0_23 = arith.constant 0 : index
      %48 = vector.load %arg2[%c0_21, %c0_22, %c0_23] : memref<1x16x32xf32, #tpu.memory_space<vmem>>, vector<1x16x32xf32>
      %49 = vector.shape_cast %48 : vector<1x16x32xf32> to vector<16x32xf32>
      %c0_24 = arith.constant 0 : index
      %c0_25 = arith.constant 0 : index
      %c0_26 = arith.constant 0 : index
      %50 = vector.load %arg5[%c0_24, %c0_25, %c0_26] : memref<1x16x32xf32, #tpu.memory_space<vmem>>, vector<1x16x32xf32>
      %51 = vector.shape_cast %50 : vector<1x16x32xf32> to vector<16x32xf32>
      %52 = vector.shape_cast %49 : vector<16x32xf32> to vector<1x16x32xf32>
      tpu.vector_store %arg5[%c0_24, %c0_25, %c0_26], %52 {strides = array<i32>} : memref<1x16x32xf32, #tpu.memory_space<vmem>>, vector<1x16x32xf32>,
    } else {
    }
    %c0 = arith.constant 0 : index
    %c0_1 = arith.constant 0 : index
    %c0_2 = arith.constant 0 : index
    %3 = vector.load %arg5[%c0, %c0_1, %c0_2] : memref<1x16x32xf32, #tpu.memory_space<vmem>>, vector<1x16x32xf32>
    %4 = vector.shape_cast %3 : vector<1x16x32xf32> to vector<16x32xf32>
    %5 = arith.index_cast %arg1 : i32 to index
    %c0_3 = arith.constant 0 : index
    %c0_4 = arith.constant 0 : index
    %c0_5 = arith.constant 0 : index
    %6 = vector.load %arg3[%5, %c0_3, %c0_4, %c0_5] : memref<2x3x32x32xf32, #tpu.memory_space<vmem>>, vector<1x3x32x32xf32>
    %7 = vector.shape_cast %6 : vector<1x3x32x32xf32> to vector<3x32x32xf32>
    %8 = vector.extract_strided_slice %7 {offsets = [0, 0, 0], sizes = [1, 32, 32], strides = [1, 1, 1]} : vector<3x32x32xf32> to vector<1x32x32xf32>
    %9 = vector.shape_cast %8 : vector<1x32x32xf32> to vector<32x32xf32>
    %10 = vector.extract_strided_slice %7 {offsets = [1, 0, 0], sizes = [1, 32, 32], strides = [1, 1, 1]} : vector<3x32x32xf32> to vector<1x32x32xf32>
    %11 = vector.shape_cast %10 : vector<1x32x32xf32> to vector<32x32xf32>
    %12 = vector.extract_strided_slice %7 {offsets = [2, 0, 0], sizes = [1, 32, 32], strides = [1, 1, 1]} : vector<3x32x32xf32> to vector<1x32x32xf32>
    %13 = vector.shape_cast %12 : vector<1x32x32xf32> to vector<32x32xf32>
    %14 = arith.index_cast %arg1 : i32 to index
    %c0_6 = arith.constant 0 : index
    %c0_7 = arith.constant 0 : index
    %c0_8 = arith.constant 0 : index
    %15 = vector.load %arg4[%14, %c0_6, %c0_7, %c0_8] : memref<2x2x8x16xf32, #tpu.memory_space<vmem>>, vector<1x2x8x16xf32>
    %16 = vector.shape_cast %15 : vector<1x2x8x16xf32> to vector<2x8x16xf32>
    %17 = vector.extract_strided_slice %16 {offsets = [0, 0, 0], sizes = [1, 8, 16], strides = [1, 1, 1]} : vector<2x8x16xf32> to vector<1x8x16xf32>
    %18 = vector.shape_cast %17 : vector<1x8x16xf32> to vector<8x16xf32>
    %19 = vector.extract_strided_slice %16 {offsets = [1, 0, 0], sizes = [1, 8, 16], strides = [1, 1, 1]} : vector<2x8x16xf32> to vector<1x8x16xf32>
    %20 = vector.shape_cast %19 : vector<1x8x16xf32> to vector<8x16xf32>
    %cst = arith.constant dense<0.000000e+00> : vector<16x32xf32>
    %21 = tpu.matmul %4, %9, %cst {dimension_numbers = #tpu.dot_dimension_numbers<[1], [0], [0], [1], [0, 0, 1, 1], [], []>} : vector<16x32xf32>, vector<32x32xf32>, vector<16x32xf32> -> vector<16x32xf32>
    %cst_9 = arith.constant dense<0.000000e+00> : vector<16x32xf32>
    %22 = tpu.matmul %4, %11, %cst_9 {dimension_numbers = #tpu.dot_dimension_numbers<[1], [0], [0], [1], [0, 0, 1, 1], [], []>} : vector<16x32xf32>, vector<32x32xf32>, vector<16x32xf32> -> vector<16x32xf32>
    %cst_10 = arith.constant dense<0.000000e+00> : vector<16x32xf32>
    %23 = tpu.matmul %4, %13, %cst_10 {dimension_numbers = #tpu.dot_dimension_numbers<[1], [0], [0], [1], [0, 0, 1, 1], [], []>} : vector<16x32xf32>, vector<32x32xf32>, vector<16x32xf32> -> vector<16x32xf32>
    %cst_11 = arith.constant dense<0.000000e+00> : vector<8x32xf32>
    %24 = tpu.matmul %18, %22, %cst_11 {dimension_numbers = #tpu.dot_dimension_numbers<[1], [0], [0], [1], [0, 0, 1, 1], [], []>} : vector<8x16xf32>, vector<16x32xf32>, vector<8x32xf32> -> vector<8x32xf32>
    %cst_12 = arith.constant dense<0.000000e+00> : vector<8x32xf32>
    %25 = tpu.matmul %20, %23, %cst_12 {dimension_numbers = #tpu.dot_dimension_numbers<[1], [0], [0], [1], [0, 0, 1, 1], [], []>} : vector<8x16xf32>, vector<16x32xf32>, vector<8x32xf32> -> vector<8x32xf32>
    %26 = vector.shape_cast %21 : vector<16x32xf32> to vector<16x4x8xf32>
    %27 = vector.shape_cast %24 : vector<8x32xf32> to vector<8x4x8xf32>
    %28 = vector.shape_cast %25 : vector<8x32xf32> to vector<8x4x8xf32>
    "tpu.trace_start"() <{level = 10 : i32, message = "nhd,khd->hnk"}> : () -> ()
    %cst_13 = arith.constant dense<0.000000e+00> : vector<4x16x8xf32>
    %29 = tpu.matmul %26, %27, %cst_13 {dimension_numbers = #tpu.dot_dimension_numbers<[2], [2], [0], [0], [0, 1, 0, 0, 1, 0], [1], [1]>} : vector<16x4x8xf32>, vector<8x4x8xf32>, vector<4x16x8xf32> -> vector<4x16x8xf32>
    "tpu.trace_stop"() : () -> ()
    %cst_14 = arith.constant 0.353553385 : f32
    %30 = vector.broadcast %cst_14 : f32 to vector<4x16x8xf32>
    %31 = arith.mulf %29, %30 : vector<4x16x8xf32>
    %cst_15 = arith.constant dense<0xFF800000> : vector<4x16xf32>
    %32 = vector.multi_reduction <maximumf>, %31, %cst_15 [2] : vector<4x16x8xf32> to vector<4x16xf32>
    %33 = vector.shape_cast %32 : vector<4x16xf32> to vector<4x16x1xf32>
    %34 = vector.broadcast %33 : vector<4x16x1xf32> to vector<4x16x8xf32>
    %35 = arith.subf %31, %34 : vector<4x16x8xf32>
    %36 = math.exp %35 : vector<4x16x8xf32>
    %cst_16 = arith.constant dense<0.000000e+00> : vector<4x16xf32>
    %37 = vector.multi_reduction <add>, %36, %cst_16 [2] : vector<4x16x8xf32> to vector<4x16xf32>
    %38 = vector.shape_cast %37 : vector<4x16xf32> to vector<4x16x1xf32>
    %39 = tpu.reciprocal %38 {approx = true} : vector<4x16x1xf32> -> vector<4x16x1xf32>
    %40 = vector.broadcast %39 : vector<4x16x1xf32> to vector<4x16x8xf32>
    %41 = arith.mulf %36, %40 : vector<4x16x8xf32>
    "tpu.trace_start"() <{level = 10 : i32, message = "hnk,khd->nhd"}> : () -> ()
    %cst_17 = arith.constant dense<0.000000e+00> : vector<4x8x16xf32>
    %42 = tpu.matmul %28, %41, %cst_17 {dimension_numbers = #tpu.dot_dimension_numbers<[0], [2], [2], [1], [0, 1, 0, 2, 1, 1], [1], [0]>} : vector<8x4x8xf32>, vector<4x16x8xf32>, vector<4x8x16xf32> -> vector<4x8x16xf32>
    %43 = tpu.transpose %42, [2, 0, 1] : vector<4x8x16xf32> -> vector<16x4x8xf32>
    "tpu.trace_stop"() : () -> ()
    %44 = vector.shape_cast %43 : vector<16x4x8xf32> to vector<16x32xf32>
    %c0_18 = arith.constant 0 : index
    %c0_19 = arith.constant 0 : index
    %c0_20 = arith.constant 0 : index
    %45 = vector.load %arg5[%c0_18, %c0_19, %c0_20] : memref<1x16x32xf32, #tpu.memory_space<vmem>>, vector<1x16x32xf32>
    %46 = vector.shape_cast %45 : vector<1x16x32xf32> to vector<16x32xf32>
    %47 = vector.shape_cast %44 : vector<16x32xf32> to vector<1x16x32xf32>
    tpu.vector_store %arg5[%c0_18, %c0_19, %c0_20], %47 {strides = array<i32>} : memref<1x16x32xf32, #tpu.memory_space<vmem>>, vector<1x16x32xf32>,
    return
  }
  func.func @transform_0(%arg0: i32, %arg1: i32) -> (i32, i32, i32) {
    %c0_i32 = arith.constant 0 : i32
    %c0_i32_0 = arith.constant 0 : i32
    %c0_i32_1 = arith.constant 0 : i32
    return %arg0, %c0_i32, %c0_i32_0 : i32, i32, i32
  }
  func.func @transform_1(%arg0: i32, %arg1: i32) -> (i32, i32, i32, i32) {
    %c0_i32 = arith.constant 0 : i32
    %c0_i32_0 = arith.constant 0 : i32
    %c0_i32_1 = arith.constant 0 : i32
    %c0_i32_2 = arith.constant 0 : i32
    %c0_i32_3 = arith.constant 0 : i32
    return %c0_i32, %c0_i32_0, %c0_i32_1, %c0_i32_2 : i32, i32, i32, i32
  }
  func.func @transform_2(%arg0: i32, %arg1: i32) -> (i32, i32, i32, i32) {
    %c0_i32 = arith.constant 0 : i32
    %c0_i32_0 = arith.constant 0 : i32
    %c0_i32_1 = arith.constant 0 : i32
    %c0_i32_2 = arith.constant 0 : i32
    %c0_i32_3 = arith.constant 0 : i32
    return %c0_i32, %c0_i32_0, %c0_i32_1, %c0_i32_2 : i32, i32, i32, i32
  }
  func.func @transform_3(%arg0: i32, %arg1: i32) -> (i32, i32, i32) {
    %c0_i32 = arith.constant 0 : i32
    %c0_i32_0 = arith.constant 0 : i32
    %c0_i32_1 = arith.constant 0 : i32
    return %arg0, %c0_i32, %c0_i32_0 : i32, i32, i32
  }
}

</mosaic_0001>

<bundles_post_ra>
// kernel: tpu_custom_call.1
= control target key start
LH: loop header
LB: loop body
LE: loop exit
PB: predicated region body
PF: predicated region fallthrough
CT: control target
= control target key end

     0   :  { %s3246_s0 = inlined_call_operand.hbm [shape: f32[2,16,32], index: 0, kind: input, shape index: {}]   ;;  %s3247_s1 = inlined_call_operand.hbm [shape: f32[2,3,32,32], index: 1, kind: input, shape index: {}]   ;;  %s3248_s2 = inlined_call_operand.hbm [shape: f32[2,2,8,16], index: 2, kind: input, shape index: {}]   ;;  %s3249_s3 = inlined_call_operand.hbm [shape: f32[2,16,32], index: 3, kind: output, shape index: {}]  }
   0x1   :  { %3256 = sst [smem:[#allocation12_spill]] %s3247_s1 }
   0x2   :  { %8 = vsyncpa [#allocation3], 0 }
   0x3   :  { %10 = vsyncpa [#allocation3 + $0x1], 0 }
   0x4   :  { %11 = vsyncpa [#allocation6], 0 }
   0x5   :  { %12 = vsyncpa [#allocation4], 0 }
   0x6   :  { %14 = vsyncpa [#allocation4 + $0x1], 0  ;;  %s2828_s12 = smov 0   ;;  %s2830_s13 = smov 0  }
   0x7   :  { %s2832_s14 = smov 0   ;;  %s2834_s15 = smov 0  }
   0x8   :  { %s2836_s16 = smov 0   ;;  %s2838_s17 = smov 0  }
   0x9   :  { %s2840_s18 = smov 0   ;;  %s2842_s19 = smov 0  }
   0xa LB: > { %s2211_s20 = sadd.s32 4294967295, %s2788_s19   ;;  %s2212_s21 = sadd.s32 4294967294, %s2788_s19   ;;  %s2788_s19 = sphi %s2842_s19, %s20_s19   ;;  %s2784_s18 = sphi %s2840_s18, %s3282_s18   ;;  %s2780_s17 = sphi %s2838_s17, %s3281_s17   ;;  %s2776_s16 = sphi %s2836_s16, %s3280_s16   ;;  %s2772_s15 = sphi %s2834_s15, %s3279_s15   ;;  %s2768_s14 = sphi %s2832_s14, %s3278_s14   ;;  %s2764_s13 = sphi %s2830_s13, %s3277_s13   ;;  %s2760_s12 = sphi %s2828_s12, %s3276_s12  }
   0xb   : > { %p52_p0 = scmp.ne.s32.totalorder %s2764_s13, %s2760_s12  ;;  %p2872_p1 = scmp.eq.s32.totalorder %s2211_s20, 0 }
   0xc   : > { %p2876_p2 = scmp.eq.s32.totalorder %s2211_s20, 3  ;;  %p124_p3 = scmp.eq.s32.totalorder %s2212_s21, 3 }
   0xd   : > { %s3257_s22 = scalar_select %p2872_p1, 1, 0 }
   0xe   : > { %s3258_s23 = scalar_select %p2876_p2, 1, 0 }
   0xf   : > { %p2882_p4 = por %p2872_p1, %p52_p0  ;;  %p2213_p5 = scmp.ge.s32.totalorder %s2788_s19, 1 }
  0x10   : > { %p2887_p6 = por %p124_p3, %p52_p0  ;;  %p131_p7 = scmp.lt.s32.totalorder %s2788_s19, 5 }
  0x11   : > { %s3259_s24 = scalar_select %p2882_p4, 1, 0 }
  0x12   : > { %s3260_s25 = scalar_select %p2887_p6, 1, 0 }
  0x13   : > { %p2892_p8 = pnand %p2213_p5, %p131_p7  ;;  %s2790_s27 = smov [#allocation5]  }
  0x14   : > { %s143_s28 = sshll.u32 %s2790_s27, 4  ;;  %s2791_s30 = smov [#allocation7]   ;;  %s144_s28 = int_to_ptr.vmem [resolvable:$true] %s143_s28 }
  0x15   : > { %s3261_s26 = scalar_select %p2892_p8, 1, 0 }
  0x16   : > { %p2467_p9 = pneg %p2892_p8  ;;  %s156_s4 = sshll.u32 %s2791_s30, 4  ;;  %s2904_s4 = int_to_ptr.vmem [resolvable:$true] %s156_s4 }
  0x17   : > { %s3263_s1 = sld [smem:[#allocation12_spill]] }
  0x18   : > { %p2900_p10 = pnand %p2467_p9, %p2872_p1 }
  0x1a   : > { %p2602_p12 = pneg %p2900_p10 }
  0x1d   : > { %s2600_s7 = scalar_lea.hbm %s3263_s1, 3072 }
  0x1e   : > { %p2601_p11 = scmp.ne.s32.totalorder %s3263_s1, %s2600_s7  ;;  %p2607_p3 = scmp.lt.u32.totalorder %s2600_s7, %s3263_s1 }
  0x20   : > { %p2603_p13 = pnand %p2602_p12, %p2601_p11 }
  0x22   : > { %p2604_p0 = pneg %p2603_p13 }
  0x24   : > { %p2609_p5 = pnand %p2607_p3, %p2604_p0 }
  0x26   : > { %2612 = shalt.err (!%p2609_p5)
}
  0x27   : > { %s2613_s20 = scalar_lea.vmem %s144_s28, 3072  ;;  %p2621_p1 = scmp.lt.s32.totalorder %s144_s28, %s144_s28 }
  0x28   : > { %p2614_p7 = scmp.ne.s32.totalorder %s144_s28, %s2613_s20  ;;  %p2622_p4 = scmp.lt.s32.totalorder %s2613_s20, %s2613_s20 }
  0x2a   : > { %p2616_p9 = pnand %p2614_p7, %p2602_p12  ;;  %p2623_p8 = por %p2622_p4, %p2621_p1 }
  0x2c   : > { %p2617_p6 = pneg %p2616_p9 }
  0x2e   : > { %p2624_p2 = pnand %p2623_p8, %p2617_p6 }
  0x30   : > { %2627 = shalt.err (!%p2624_p2)
}
  0x31   : > { %s3254_s21 = smov 128   ;;  %s3255_s27 = smov 8  }
  0x32   : > { %2470 = dma.hbm_to_vmem [thread:$0]  (!%p2900_p10), %s3263_s1, 3072, %s144_s28, [#allocation6], %s3254_s21, %s3254_s21, %s3255_s27  }
  0x33   : > { %s2628_s8 = scalar_lea.hbm %s3248_s2, 512 }
  0x34   : > { %p2629_p1 = scmp.ne.s32.totalorder %s3248_s2, %s2628_s8  ;;  %p2635_p6 = scmp.lt.u32.totalorder %s2628_s8, %s3248_s2 }
  0x36   : > { %p2631_p2 = pnand %p2629_p1, %p2602_p12 }
  0x38   : > { %p2632_p4 = pneg %p2631_p2 }
  0x3a   : > { %p2637_p8 = pnand %p2635_p6, %p2632_p4 }
  0x3c   : > { %2640 = shalt.err (!%p2637_p8)
}
  0x3d   : > { %s2641_s28 = scalar_lea.vmem %s2904_s4, 512  ;;  %p2649_p3 = scmp.lt.s32.totalorder %s2904_s4, %s2904_s4 }
  0x3e   : > { %p2642_p11 = scmp.ne.s32.totalorder %s2904_s4, %s2641_s28  ;;  %p2650_p5 = scmp.lt.s32.totalorder %s2641_s28, %s2641_s28 }
  0x40   : > { %p2644_p13 = pnand %p2642_p11, %p2602_p12  ;;  %p2651_p7 = por %p2650_p5, %p2649_p3 }
  0x42   : > { %p2645_p0 = pneg %p2644_p13 }
  0x44   : > { %p2652_p9 = pnand %p2651_p7, %p2645_p0 }
  0x46   : > { %2655 = shalt.err (!%p2652_p9)
}
  0x47   : > { %2473 = dma.hbm_to_vmem [thread:$0]  (!%p2900_p10), %s3248_s2, 512, %s2904_s4, [#allocation6], %s3254_s21, %s3254_s21, %s3255_s27  }
  0x48   : > { %s29_s29 = sadd.s32 1, %s2780_s17  ;;  %s32_s6 = sadd.s32 1, %s2784_s18 }
  0x49   : > { %p30_p12 = scmp.ge.s32.totalorder %s29_s29, 2  ;;  %s39_s7 = sadd.s32 1, %s2768_s14 }
  0x4a   : > { %p46_p1 = scmp.ne.s32.totalorder %s2768_s14, %s2764_s13  ;;  %p47_p2 = scmp.eq.s32.totalorder %s2788_s19, 0 }
  0x4b   : > { %s3284_s29 = smov (%p30_p12, %s29_s29), 0  ;;  %s3286_s6 = smov (!%p30_p12, %s32_s6), %s2784_s18 }
  0x4c   : > { %p2968_p4 = por %p47_p2, %p46_p1  ;;  %p3265_p6 = scmp.ne.s32.totalorder %s3258_s23, 0 }
  0x4d   : > { %p34_p10 = scmp.ge.s32.totalorder %s3286_s6, 2  ;;  %p2484_p11 = scmp.lt.s32.totalorder %s2788_s19, 4 }
  0x4e   : > { %p2974_p8 = por %p3265_p6, %p46_p1  ;;  %s170_s4 = sand.u32 1, %s2768_s14  }
  0x4f   : > { %s2264_s10 = sshll.u32 %s2784_s18, 8  ;;  %s3288_s6 = smov (%p34_p10, %s3286_s6), 0 }
  0x50   : > { %s2217_s11 = sshll.u32 %s170_s4, 4  ;;  %s36_s20 = ssub.s32 %s2784_s18, %s3288_s6 }
  0x51   : > { %p37_p13 = scmp.eq.s32.totalorder %s36_s20, 0  ;;  %s2988_s5 = scalar_lea.hbm %s3246_s0, %s2264_s10 }
  0x52   : > { %s174_s23 = scalar_lea.vmem [#allocation2], %s2217_s11  ;;  %p2992_p0 = pnand %p2484_p11, %p2968_p4 }
  0x53   : > { %s181_s21 = sshll.u32 %s174_s23, 4  ;;  %s3001_s20 = scalar_lea.sflag [#allocation3], %s170_s4  ;;  %s2999_s21 = int_to_ptr.vmem [resolvable:$true] %s181_s21 }
  0x54   : > { %s2997_s1 = scalar_select %p37_p13, %s2768_s14, %s39_s7  }
  0x55   : > { %s2656_s10 = scalar_lea.hbm %s2988_s5, 256  ;;  %p2658_p5 = pneg %p2992_p0 }
  0x56   : > { %p2657_p3 = scmp.ne.s32.totalorder %s2988_s5, %s2656_s10  ;;  %s2661_s28 = scalar_lea.hbm %s3246_s0, 512 }
  0x57   : > { %p2662_p12 = scmp.lt.u32.totalorder %s2988_s5, %s3246_s0  ;;  %p2663_p1 = scmp.lt.u32.totalorder %s2661_s28, %s2656_s10 }
  0x58   : > { %p2659_p7 = pnand %p2658_p5, %p2657_p3  ;;  %p2665_p4 = scmp.lt.u32.totalorder %s2656_s10, %s2988_s5 }
  0x59   : > { %p2664_p2 = por %p2663_p1, %p2662_p12 }
  0x5a   : > { %p2660_p9 = pneg %p2659_p7 }
  0x5b   : > { %p2666_p6 = por %p2665_p4, %p2664_p2 }
  0x5d   : > { %p2667_p10 = pnand %p2666_p6, %p2660_p9 }
  0x5f   : > { %2670 = shalt.err (!%p2667_p10)
}
  0x60   : > { %s2671_s7 = scalar_lea.vmem %s2999_s21, 256  ;;  %s2794_s4 = smov [#allocation2]  }
  0x61   : > { %p2672_p11 = scmp.ne.s32.totalorder %s2999_s21, %s2671_s7  ;;  %s2676_s8 = sshll.u32 %s2794_s4, 4  ;;  %s2677_s8 = int_to_ptr.vmem [resolvable:$false] %s2676_s8 }
  0x62   : > { %s2678_s11 = scalar_lea.vmem %s2677_s8, 512  ;;  %p2679_p7 = scmp.lt.s32.totalorder %s2999_s21, %s2677_s8 }
  0x63   : > { %p2674_p13 = pnand %p2672_p11, %p2658_p5  ;;  %p2680_p12 = scmp.lt.s32.totalorder %s2678_s11, %s2671_s7 }
  0x65   : > { %p2675_p3 = pneg %p2674_p13  ;;  %p2681_p1 = por %p2680_p12, %p2679_p7 }
  0x67   : > { %p2682_p2 = pnand %p2681_p1, %p2675_p3 }
  0x69   : > { %2685 = shalt.err (!%p2682_p2)
}
  0x6a   : > { %s3268_s10 = smov 8   ;;  %s3269_s28 = smov 128  }
  0x6b   : > { %2477 = dma.hbm_to_vmem [thread:$0]  (!%p2992_p0), %s2988_s5, 256, %s2999_s21, %s3001_s20, %s3269_s28, %s3269_s28, %s3268_s10  }
  0x6c   : > { %p3270_p5 = scmp.ne.s32.totalorder %s3261_s26, 0 }
  0x6d   : > { %s3035_s30 = sand.u32 (!%p3270_p5), 1, %s2764_s13   ;;  %p3271_p9 = scmp.ne.s32.totalorder (!%p3270_p5), %s3259_s24, 0 }
  0x6e   : > { %193 = sbr.rel (%p3270_p5) target bundleno = 1995 (0x7cb), region = 32  ;;  %s2221_s23 = sshll.u32 (!%p3270_p5), %s3035_s30, 4 }
  0x6f   : > { %s196_s7 = scalar_lea.sflag (!%p3270_p5), [#allocation3], %s3035_s30  ;;  %s199_s4 = scalar_lea.vmem (!%p3270_p5), [#allocation2], %s2221_s23 }
  0x75   : > { %2747 = dma.done.wait (%p3271_p9), %s196_s7, 256  }
  0x76   : > { %2749 = vsyncadd (%p3271_p9), %s196_s7, 4294967040  ;;  %p3272_p4 = scmp.ne.s32.totalorder %s3257_s22, 0 }
  0x78   : > { %2751 = dma.done.wait (%p3272_p4), [#allocation6], 3584  }
  0x79   : > { %2753 = vsyncadd (%p3272_p4), [#allocation6], 4294963712  ;;  %s3047_s26 = scalar_lea.vmem [#allocation8], %s2221_s23  ;;  %p2225_p0 = scmp.ne.s32.totalorder %s2772_s15, 0 }
  0x7a   : > { %v234_v0 = vld [vmem:[%s199_s4] sm:$0xff] (!%p2225_p0)  ;;  %vm236_vm0 = vcmask (!%p2225_p0), 261120   ;;  %v235_v1 = vld [vmem:[%s199_s4 + $0x8] sm:$0xff] (!%p2225_p0) }
  0x7b   : > { %233 = sbr.rel (%p2225_p0) target bundleno = 130 (0x82), region = 48  ;;  %237 = vst.msk [vmem:[%s3047_s26] sm:$0xff] (!%p2225_p0), %vm236_vm0, %v234_v0  ;;  %238 = vst.msk [vmem:[%s3047_s26 + $0x8] sm:$0xff] (!%p2225_p0), %vm236_vm0, %v235_v1 }
  0x82 PF: > { %s241_s24 = smul.u32 96, %s2772_s15  ;;  %v239_v2 = vld [vmem:[%s3047_s26] sm:$0xff]  ;;  %vm259_vm1 = vcmask 261120   ;;  %v240_v9 = vld [vmem:[%s3047_s26 + $0x8] sm:$0xff]  ;;  %v2795_v13 = vmov 0.0|0.0   ;;  %vm2796_vm2 = vmmov 0  }
  0x83   : > { %2333 = vmatprep.mubr.msk.f32.mxu1 %vm259_vm1, %v239_v2  ;;  %2322 = vmatprep.mubr.msk.f32.mxu0 %vm259_vm1, %v239_v2  ;;  %v2797_v17 = vmov 0.0   ;;  %s2226_s21 = sshll.u32 %s2772_s15, 4  ;;  %vm491_vm3 = vcmask 130048   ;;  %vm800_vm4 = vcmask 64512   ;;  %s2798_s15 = smov 104   ;;  %vm2085_vm6 = vcmask 195584  }
  0x84   : > { %s3056_s22 = scalar_lea.vmem [#allocation5], %s241_s24  ;;  %s256_s27 = scalar_lea.vmem [#allocation7], %s2226_s21  ;;  %vm3134_vm5 = vmpackc.low %vm800_vm4, %vm800_vm4 }
  0x85   : > { %v247_v3 = vld [vmem:[%s3056_s22 + $0x20] sm:$0xff]  ;;  %v248_v4 = vld [vmem:[%s3056_s22 + $0x28] sm:$0xff]  ;;  %v249_v5 = vld [vmem:[%s3056_s22 + $0x30] sm:$0xff]  ;;  %s2799_s5 = smov 120   ;;  %s2800_s20 = smov 112  }
  0x86   : > { %v2417_v6 = vpack.c.bf16 %v248_v4, %v247_v3  ;;  %v250_v7 = vld [vmem:[%s3056_s22 + $0x38] sm:$0xff]  ;;  %v243_v10 = vld [vmem:[%s3056_s22] sm:$0xff]  ;;  %v244_v11 = vld [vmem:[%s3056_s22 + $0x8] sm:$0xff]  ;;  %s2803_s8 = smov 16   ;;  %s2804_s11 = smov 8  }
  0x87   : > { %v2421_v8 = vpack.c.bf16 %v250_v7, %v249_v5  ;;  %v2409_v12 = vpack.c.bf16 %v244_v11, %v243_v10  ;;  %v245_v14 = vld [vmem:[%s3056_s22 + $0x10] sm:$0xff]  ;;  %v246_v15 = vld [vmem:[%s3056_s22 + $0x18] sm:$0xff]  ;;  %v251_v18 = vld [vmem:[%s3056_s22 + $0x40] sm:$0xff]  ;;  %s2805_s10 = smov 24   ;;  %s2265_s28 = sshll.u32 %s2776_s16, 8 }
  0x88   : > { %2418 = vmatprep.subr.bf16.mxu1 %v2417_v6  ;;  %v2413_v16 = vpack.c.bf16 %v246_v15, %v245_v14  ;;  %v252_v19 = vld [vmem:[%s3056_s22 + $0x48] sm:$0xff]  ;;  %v253_v20 = vld [vmem:[%s3056_s22 + $0x50] sm:$0xff]  ;;  %v254_v22 = vld [vmem:[%s3056_s22 + $0x58] sm:$0xff]  ;;  %s2104_s23 = sshll.u32 %s3047_s26, 4  ;;  %s3186_s24 = scalar_lea.hbm %s3249_s3, %s2265_s28  ;;  %s3189_s23 = int_to_ptr.vmem [resolvable:$true] %s2104_s23 }
  0x89   : > { %2420 = vmatpush3.bf16.msra.mxu1 %v2417_v6  ;;  %2410 = vmatprep.subr.bf16.mxu0 %v2409_v12  ;;  %v2425_v21 = vpack.c.bf16 %v252_v19, %v251_v18  ;;  %v2429_v23 = vpack.c.bf16 %v254_v22, %v253_v20  ;;  %v257_v27 = vld [vmem:[%s256_s27] sm:$0xff]  ;;  %v258_v35 = vld [vmem:[%s256_s27 + $0x8] sm:$0xff]  ;;  %s2091_s16 = scalar_lea.sflag [#allocation4], %s3035_s30  ;;  %s2686_s22 = scalar_lea.vmem %s3189_s23, 256 }
  0x8a   : > { %2422 = vmatprep.subr.bf16.mxu1 %v2421_v8  ;;  %2412 = vmatpush3.bf16.msra.mxu0 %v2409_v12  ;;  %p2687_p6 = scmp.ne.s32.totalorder %s3189_s23, %s2686_s22  ;;  %s2806_s21 = smov [#allocation8]  }
  0x8b   : > { %2414 = vmatprep.subr.bf16.mxu0 %v2413_v16  ;;  %s2690_s27 = sshll.u32 %s2806_s21, 4  ;;  %s2691_s27 = int_to_ptr.vmem [resolvable:$false] %s2690_s27 }
  0x8c   : > { %p2688_p10 = pnand %p2687_p6, %p2974_p8  ;;  %p2693_p13 = scmp.lt.s32.totalorder %s3189_s23, %s2691_s27 }
  0x8d   : > { %2424 = vmatpush3.bf16.msra.mxu1 %v2421_v8 }
  0x8e   : > { %2433 = vmatprep.subr.bf16.mxu1 %v2795_v13  ;;  %2416 = vmatpush3.bf16.msra.mxu0 %v2413_v16  ;;  %p2689_p11 = pneg %p2688_p10 }
  0x8f   : > { %2426 = vmatprep.subr.bf16.mxu0 %v2425_v21 }
  0x90   : > { %2334 = vmatmul.mubr.msk.f32.vlgmr.msra.gmra.mrb[0].mxu1 %vm259_vm1, %v240_v9 }
  0x91   : > { %2351 = vmatprep.mubr.msk.f32.mxu1 %vm2796_vm2, %v2797_v17  ;;  %2323 = vmatmul.mubr.msk.f32.vlgmr.msra.gmra.mrb[0].mxu0 %vm259_vm1, %v240_v9 }
  0x92   : > { %2428 = vmatpush3.bf16.msra.mxu0 %v2425_v21  ;;  %2344 = vmatprep.mubr.msk.f32.mxu0 %vm259_vm1, %v239_v2 }
  0x93   : > { %2430 = vmatprep.subr.bf16.mxu0 %v2429_v23 }
  0x96   : > { %2432 = vmatpush3.bf16.msra.mxu0 %v2429_v23 }
  0x99   : > { %2345 = vmatmul.mubr.msk.f32.vlgmr.msra.gmra.mrb[2].mxu0 %vm259_vm1, %v240_v9 }
 0x163   : > { %v2335_v24 = vpop.f32.mrb[0].mxu1 }
 0x164   : > { %v407_v25 = vpop.f32.mrb[1].mxu1  ;;  %v2324_v28 = vpop.f32.mrb[0].mxu0 }
 0x165   : > { %v2434_v26 = vpack.c.bf16 %v2335_v24, %v407_v25  ;;  %v332_v29 = vpop.f32.mrb[1].mxu0 }
 0x166   : > { %2363 = vmatprep.mubr.msk.f32.mxu0 %vm800_vm4, %v332_v29 }
 0x167   : > { %2435 = vmatpush3.bf16.msra.mxu1 %v2434_v26 }
 0x168   : > { %2436 = vmatprep.subr.bf16.mxu1 %v2795_v13 }
 0x16a   : > { %2352 = vmatmul.mubr.msk.f32.vlgmr.msra.gmra.mrb[2].mxu1 %vm491_vm3, %v257_v27 }
 0x16b   : > { %2358 = vmatprep.mubr.msk.f32.mxu1 %vm2796_vm2, %v2797_v17 }
 0x16c   : > { %v2346_v30 = vpop.f32.mrb[2].mxu0 }
 0x16d   : > { %v482_v31 = vpop.f32.mrb[3].mxu0 }
 0x16e   : > { %v2437_v32 = vpack.c.bf16 %v2346_v30, %v482_v31 }
 0x170   : > { %2438 = vmatpush3.bf16.msra.mxu1 %v2437_v32 }
 0x173   : > { %2359 = vmatmul.mubr.msk.f32.vlgmr.msra.gmra.mrb[4].mxu1 %vm491_vm3, %v258_v35 }
 0x23d   : > { %v561_v33 = vpop.f32.mrb[2].mxu1 }
 0x23e   : > { %659 = vrot.lane.b32.xlu1 %v561_v33, %s2798_s15  ;;  %653 = vrot.lane.b32.xlu0 %v561_v33, %s2799_s5  ;;  %v2353_v34 = vpop.f32.mrb[3].mxu1 }
 0x242   : > { %656 = vrot.lane.b32.xlu0 %v561_v33, %s2800_s20  ;;  %640 = vrot.lane.b32.xlu1 %v332_v29, %s2799_s5 }
 0x246   : > { %644 = vrot.lane.b32.xlu1 %v332_v29, %s2800_s20  ;;  %642 = vrot.lane.b32.xlu0 %v2324_v28, %s2799_s5  ;;  %v3107_v49 = vpop.f32.mrb[4].mxu1 }
 0x247   : > { %v2360_v50 = vpop.f32.mrb[5].mxu1 }
 0x24a   : > { %646 = vrot.lane.b32.xlu1 %v2324_v28, %s2800_s20  ;;  %648 = vrot.lane.b32.xlu0 %v332_v29, %s2798_s15 }
 0x24e   : > { %650 = vrot.lane.b32.xlu0 %v2324_v28, %s2798_s15 }
 0x273   : > { %672 = vxpose.xlu1.b32.start.end [1/1] (short) (narrow) %v561_v33, 8 }
 0x2b0   : > { %v660_v36 = vpop.permute.xlu1 %659  ;;  %v654_v37 = vpop.permute.xlu0 %653 }
 0x2b1   : > { %704 = vxpose.xlu0.b32.start.end [1/1] (short) (narrow) %v654_v37, 8 }
 0x2b4   : > { %v657_v38 = vpop.permute.xlu0 %656  ;;  %v641_v39 = vpop.permute.xlu1 %640 }
 0x2b5   : > { %736 = vxpose.xlu0.b32.start.end [1/1] (short) (narrow) %v657_v38, 8  ;;  %2368 = vmatprep.mubr.msk.f32.mxu1 %vm800_vm4, %v641_v39 }
 0x2b8   : > { %v645_v40 = vpop.permute.xlu1 %644  ;;  %v643_v43 = vpop.permute.xlu0 %642 }
 0x2b9   : > { %768 = vxpose.xlu0.b32.start.end [1/1] (short) (narrow) %v660_v36, 8 }
 0x2bc   : > { %v647_v41 = vpop.permute.xlu1 %646  ;;  %v649_v44 = vpop.permute.xlu0 %648 }
 0x2c0   : > { %v651_v45 = vpop.permute.xlu0 %650 }
 0x2f3   : > { %v688_v42 = vpop.trf.xlu1 }
 0x2f4   : > { %2361 = vmatprep.subr.mxu0 %v688_v42 }
 0x2f5   : > { %2362 = vmatpush3.msra.mxu0 %v688_v42 }
 0x2f6   : > { %2364 = vmatmul.mubr.msk.f32.vlgmr.msra.gmra.mrb[4].mxu0 %vm800_vm4, %v2324_v28 }
 0x2f7   : > { %2373 = vmatprep.mubr.msk.f32.mxu0 %vm800_vm4, %v645_v40 }
 0x331   : > { %v720_v46 = vpop.trf.xlu0 }
 0x332   : > { %2366 = vmatprep.subr.mxu1 %v720_v46 }
 0x333   : > { %2367 = vmatpush3.msra.mxu1 %v720_v46 }
 0x334   : > { %2369 = vmatmul.mubr.msk.f32.vlgmr.msra.gmra.mrb[6].mxu1 %vm800_vm4, %v643_v43 }
 0x335   : > { %v752_v47 = vpop.trf.xlu0  ;;  %2378 = vmatprep.mubr.msk.f32.mxu1 %vm800_vm4, %v649_v44 }
 0x336   : > { %2371 = vmatprep.subr.mxu0 %v752_v47 }
 0x337   : > { %2372 = vmatpush3.msra.mxu0 %v752_v47 }
 0x338   : > { %2374 = vmatmul.mubr.msk.f32.vlgmr.msra.gmra.mrb[6].mxu0 %vm800_vm4, %v647_v41  ;;  %2439 = vmatprep.subr.bf16.mxu0 %v2795_v13 }
 0x339   : > { %v784_v48 = vpop.trf.xlu0  ;;  %2385 = vmatprep.mubr.msk.f32.mxu0 %vm2796_vm2, %v2797_v17 }
 0x33a   : > { %2376 = vmatprep.subr.mxu1 %v784_v48 }
 0x33b   : > { %2377 = vmatpush3.msra.mxu1 %v784_v48 }
 0x33c   : > { %2379 = vmatmul.mubr.msk.f32.vlgmr.msra.gmra.mrb[8].mxu1 %vm800_vm4, %v651_v45  ;;  %2443 = vmatprep.subr.bf16.mxu1 %v2795_v13 }
 0x33d   : > { %2392 = vmatprep.mubr.msk.f32.mxu1 %vm2796_vm2, %v2797_v17 }
 0x3c9   : > { %v2365_v51 = vpop.f32.mrb[4].mxu0 }
 0x3ca   : > { %v1118_v52 = vmul.f32 0.35355338, %v2365_v51  ;;  %v871_v53 = vpop.f32.mrb[5].mxu0 }
 0x3cb   : > { %v1117_v54 = vmul.f32 0.35355338, %v871_v53 }
 0x3cc   : > { %v1128_v55 = vsel %vm800_vm4, %v1118_v52, -inf }
 0x3cd   : > { %1129 = vmax.xlane.f32.xlu0 %v1128_v55  ;;  %v1125_v56 = vsel %vm800_vm4, %v1117_v54, -inf }
 0x3ce   : > { %1126 = vmax.xlane.f32.xlu1 %v1125_v56 }
 0x407   : > { %v2370_v57 = vpop.f32.mrb[6].mxu1 }
 0x408   : > { %v1120_v58 = vmul.f32 0.35355338, %v2370_v57  ;;  %v950_v59 = vpop.f32.mrb[7].mxu1 }
 0x409   : > { %v1119_v60 = vmul.f32 0.35355338, %v950_v59 }
 0x40a   : > { %v1134_v61 = vsel %vm800_vm4, %v1120_v58, -inf }
 0x40b   : > { %v2375_v62 = vpop.f32.mrb[6].mxu0  ;;  %1135 = vmax.xlane.f32.xlu1 %v1134_v61  ;;  %v1131_v2 = vsel %vm800_vm4, %v1119_v60, -inf }
 0x40c   : > { %v1029_v63 = vpop.f32.mrb[7].mxu0  ;;  %v1122_v1 = vmul.f32 0.35355338, %v2375_v62 }
 0x40d   : > { %v1121_v0 = vmul.f32 0.35355338, %v1029_v63 }
 0x40e   : > { %v1140_v8 = vsel %vm800_vm4, %v1122_v1, -inf }
 0x40f   : > { %1132 = vmax.xlane.f32.xlu1 %v1131_v2  ;;  %v2380_v3 = vpop.f32.mrb[8].mxu1  ;;  %v1137_v4 = vsel %vm800_vm4, %v1121_v0, -inf }
 0x410   : > { %1138 = vmax.xlane.f32.xlu0 %v1137_v4  ;;  %v1108_v5 = vpop.f32.mrb[9].mxu1  ;;  %v1124_v7 = vmul.f32 0.35355338, %v2380_v3 }
 0x411   : > { %v1123_v6 = vmul.f32 0.35355338, %v1108_v5 }
 0x412   : > { %v1146_v10 = vsel %vm800_vm4, %v1124_v7, -inf }
 0x413   : > { %1141 = vmax.xlane.f32.xlu1 %v1140_v8  ;;  %v1143_v9 = vsel %vm800_vm4, %v1123_v6, -inf }
 0x414   : > { %1144 = vmax.xlane.f32.xlu0 %v1143_v9 }
 0x417   : > { %1147 = vmax.xlane.f32.xlu1 %v1146_v10 }
 0x42a   : > { %663 = vrot.lane.b32.xlu0 %v3107_v49, %s2799_s5 }
 0x45a   : > { %v1130_v11 = vpop.xlane.xlu0 %1129 }
 0x45b   : > { %v1150_v12 = vsub.f32 %v1118_v52, %v1130_v11  ;;  %v1127_v14 = vpop.xlane.xlu1 %1126 }
 0x45c   : > { %v1149_v15 = vsub.f32 %v1117_v54, %v1127_v14 }
 0x45d   : > { %v1159_v16 = vmul.f32 1.442695, %v1150_v12 }
 0x45e   : > { %v1157_v18 = vmul.f32 1.442695, %v1149_v15 }
 0x45f   : > { %2568 = vpow2.f32 %v1159_v16 }
 0x460   : > { %2570 = vpow2.f32 %v1157_v18 }
 0x469   : > { %v2569_v19 = vpop.eup %2568 }
 0x46a   : > { %v2571_v20 = vpop.eup %2570  ;;  %v1176_v21 = vsel %vm800_vm4, %v2569_v19, 0.0 }
 0x46b   : > { %1177 = vadd.xlane.f32.xlu1 %v1176_v21  ;;  %v1173_v22 = vsel %vm800_vm4, %v2571_v20, 0.0 }
 0x46c   : > { %1174 = vadd.xlane.f32.xlu0 %v1173_v22 }
 0x498   : > { %v1136_v23 = vpop.xlane.xlu1 %1135 }
 0x499   : > { %v1152_v24 = vsub.f32 %v1120_v58, %v1136_v23 }
 0x49b   : > { %v1163_v25 = vmul.f32 1.442695, %v1152_v24 }
 0x49c   : > { %v1133_v26 = vpop.xlane.xlu1 %1132 }
 0x49d   : > { %2572 = vpow2.f32 %v1163_v25  ;;  %v1151_v27 = vsub.f32 %v1119_v60, %v1133_v26  ;;  %v1139_v28 = vpop.xlane.xlu0 %1138 }
 0x49e   : > { %v1153_v30 = vsub.f32 %v1121_v0, %v1139_v28 }
 0x49f   : > { %v1161_v29 = vmul.f32 1.442695, %v1151_v27 }
 0x4a0   : > { %v1142_v31 = vpop.xlane.xlu1 %1141  ;;  %v1165_v33 = vmul.f32 1.442695, %v1153_v30 }
 0x4a1   : > { %2574 = vpow2.f32 %v1161_v29  ;;  %v1154_v32 = vsub.f32 %v1122_v1, %v1142_v31  ;;  %v1145_v35 = vpop.xlane.xlu0 %1144 }
 0x4a2   : > { %v1155_v39 = vsub.f32 %v1123_v6, %v1145_v35 }
 0x4a3   : > { %v1167_v34 = vmul.f32 1.442695, %v1154_v32 }
 0x4a4   : > { %v1148_v36 = vpop.xlane.xlu1 %1147  ;;  %v1169_v43 = vmul.f32 1.442695, %v1155_v39  ;;  %v1790_v39 = vlaneseq }
 0x4a5   : > { %2576 = vpow2.f32 %v1167_v34  ;;  %v1156_v37 = vsub.f32 %v1124_v7, %v1148_v36  ;;  %v664_v54 = vpop.permute.xlu0 %663 }
 0x4a6   : > { %2578 = vpow2.f32 %v1165_v33 }
 0x4a7   : > { %v2573_v38 = vpop.eup %2572  ;;  %v1171_v40 = vmul.f32 1.442695, %v1156_v37  ;;  %v2801_v37 = vmov 1983009808  }
 0x4a8   : > { %v1182_v41 = vsel %vm800_vm4, %v2573_v38, 0.0 }
 0x4a9   : > { %1183 = vadd.xlane.f32.xlu1 %v1182_v41  ;;  %2580 = vpow2.f32 %v1171_v40  ;;  %v2802_v40 = vmov 1934713408  }
 0x4aa   : > { %2582 = vpow2.f32 %v1169_v43  ;;  %v1820_v41 = vunpack.c.l.s4 %v2802_v40  ;;  %v1791_v43 = vshrl.u32 %v1790_v39, 7 }
 0x4ab   : > { %v2575_v42 = vpop.eup %2574 }
 0x4ac   : > { %v1179_v44 = vsel %vm800_vm4, %v2575_v42, 0.0 }
 0x4ad   : > { %1180 = vadd.xlane.f32.xlu0 %v1179_v44 }
 0x4af   : > { %v2577_v45 = vpop.eup %2576 }
 0x4b0   : > { %v1188_v46 = vsel %vm800_vm4, %v2577_v45, 0.0  ;;  %v2579_v47 = vpop.eup %2578 }
 0x4b1   : > { %1189 = vadd.xlane.f32.xlu1 %v1188_v46  ;;  %v1185_v48 = vsel %vm800_vm4, %v2579_v47, 0.0 }
 0x4b3   : > { %v2581_v50 = vpop.eup %2580 }
 0x4b4   : > { %v1194_v51 = vsel %vm800_vm4, %v2581_v50, 0.0  ;;  %v2583_v52 = vpop.eup %2582 }
 0x4b5   : > { %1186 = vadd.xlane.f32.xlu1 %v1185_v48  ;;  %v1191_v53 = vsel %vm800_vm4, %v2583_v52, 0.0 }
 0x4b9   : > { %1195 = vadd.xlane.f32.xlu1 %v1194_v51 }
 0x4bd   : > { %1192 = vadd.xlane.f32.xlu1 %v1191_v53 }
 0x4c3   : > { %669 = vrot.lane.b32.xlu0 %v3107_v49, %s2798_s15  ;;  %s2692_s15 = scalar_lea.vmem %s2691_s27, 512 }
 0x4c4   : > { %p2694_p3 = scmp.lt.s32.totalorder %s2692_s15, %s2686_s22 }
 0x4c6   : > { %p2695_p7 = por %p2694_p3, %p2693_p13 }
 0x4c8   : > { %p2696_p12 = pnand %p2695_p7, %p2689_p11 }
 0x4ce   : > { %666 = vrot.lane.b32.xlu1 %v3107_v49, %s2800_s20 }
 0x4e1   : > { %1213 = vxpose.xlu0.b32.start.end [1/1] (short) (narrow) %v3107_v49, 8 }
 0x4f7   : > { %1245 = vxpose.xlu1.b32.start.end [1/1] (short) (narrow) %v664_v54, 8 }
 0x4f8   : > { %v1178_v55 = vpop.xlane.xlu1 %1177 }
 0x4f9   : > { %2584 = vrcp.f32 %v1178_v55  ;;  %v1175_v56 = vpop.xlane.xlu0 %1174 }
 0x4fa   : > { %2586 = vrcp.f32 %v1175_v56 }
 0x503   : > { %v2585_v57 = vpop.eup %2584 }
 0x504   : > { %v2587_v58 = vpop.eup %2586  ;;  %v1206_v59 = vmul.f32 %v2585_v57, %v2569_v19 }
 0x505   : > { %v1205_v60 = vmul.f32 %v2587_v58, %v2571_v20 }
 0x507   : > { %v2440_v62 = vpack.c.bf16 %v1206_v59, %v1205_v60 }
 0x509   : > { %2442 = vmatpush3.bf16.xpose.msk.msra.mxu0 %vm3134_vm5, %v2440_v62 }
 0x50a   : > { %2447 = vmatprep.subr.bf16.mxu0 %v2795_v13 }
 0x536   : > { %v1184_v49 = vpop.xlane.xlu1 %1183 }
 0x537   : > { %2588 = vrcp.f32 %v1184_v49 }
 0x53a   : > { %v1181_v63 = vpop.xlane.xlu0 %1180 }
 0x53b   : > { %2590 = vrcp.f32 %v1181_v63 }
 0x53e   : > { %v1190_v0 = vpop.xlane.xlu1 %1189  ;;  %v670_v10 = vpop.permute.xlu0 %669 }
 0x541   : > { %v2589_v2 = vpop.eup %2588 }
 0x542   : > { %v1187_v1 = vpop.xlane.xlu1 %1186  ;;  %v1208_v4 = vmul.f32 %v2589_v2, %v2573_v38  ;;  %v1788_v38 = vunpack.c.l.s4 %v2801_v37 }
 0x543   : > { %2592 = vrcp.f32 %v1187_v1 }
 0x544   : > { %2594 = vrcp.f32 %v1190_v0 }
 0x545   : > { %v2591_v3 = vpop.eup %2590 }
 0x546   : > { %v1207_v5 = vmul.f32 %v2591_v3, %v2575_v42  ;;  %v1196_v6 = vpop.xlane.xlu1 %1195  ;;  %v1789_v42 = vunpack.c.0.s8 %v1788_v38 }
 0x548   : > { %v2444_v7 = vpack.c.bf16 %v1208_v4, %v1207_v5  ;;  %v1792_v46 = vsub.s32 %v1789_v42, %v1791_v43 }
 0x54a   : > { %v1193_v8 = vpop.xlane.xlu1 %1192  ;;  %2446 = vmatpush3.bf16.xpose.msk.msra.mxu1 %vm3134_vm5, %v2444_v7 }
 0x54b   : > { %2451 = vmatprep.subr.bf16.mxu1 %v2795_v13  ;;  %2596 = vrcp.f32 %v1193_v8 }
 0x54c   : > { %2598 = vrcp.f32 %v1196_v6 }
 0x54d   : > { %v2593_v11 = vpop.eup %2592 }
 0x54e   : > { %v667_v9 = vpop.permute.xlu1 %666  ;;  %v2595_v12 = vpop.eup %2594  ;;  %v1209_v14 = vmul.f32 %v2593_v11, %v2579_v47 }
 0x54f   : > { %1277 = vxpose.xlu0.b32.start.end [1/1] (short) (narrow) %v667_v9, 8  ;;  %v1210_v15 = vmul.f32 %v2595_v12, %v2577_v45  ;;  %v1821_v45 = vunpack.c.0.s8 %v1820_v41 }
 0x551   : > { %v2448_v18 = vpack.c.bf16 %v1210_v15, %v1209_v14  ;;  %v3156_v54 = vsub.s32 %v1821_v45, %v1791_v43 }
 0x553   : > { %1309 = vxpose.xlu0.b32.start.end [1/1] (short) (narrow) %v670_v10, 8 }
 0x555   : > { %v2597_v13 = vpop.eup %2596 }
 0x556   : > { %v2599_v19 = vpop.eup %2598  ;;  %v1211_v20 = vmul.f32 %v2597_v13, %v2583_v52 }
 0x557   : > { %v1212_v21 = vmul.f32 %v2599_v19, %v2581_v50 }
 0x559   : > { %v2452_v23 = vpack.c.bf16 %v1212_v21, %v1211_v20 }
 0x561   : > { %v1229_v16 = vpop.trf.xlu0 }
 0x562   : > { %2386 = vmatmul.mubr.msk.f32.vlgmr.msra.gmra.mrb[8].mxu0 %vm800_vm4, %v1229_v16 }
 0x563   : > { %2450 = vmatpush3.bf16.xpose.msk.msra.mxu0 %vm3134_vm5, %v2448_v18  ;;  %2399 = vmatprep.mubr.msk.f32.mxu0 %vm2796_vm2, %v2797_v17 }
 0x577   : > { %v1261_v22 = vpop.trf.xlu1 }
 0x578   : > { %2393 = vmatmul.mubr.msk.f32.vlgmr.msra.gmra.mrb[10].mxu1 %vm800_vm4, %v1261_v22 }
 0x579   : > { %2454 = vmatpush3.bf16.xpose.msk.msra.mxu1 %vm3134_vm5, %v2452_v23  ;;  %2406 = vmatprep.mubr.msk.f32.mxu1 %vm2796_vm2, %v2797_v17 }
 0x5cf   : > { %v1293_v24 = vpop.trf.xlu0 }
 0x5d0   : > { %2400 = vmatmul.mubr.msk.f32.vlgmr.msra.gmra.mrb[10].mxu0 %vm800_vm4, %v1293_v24 }
 0x5d3   : > { %v1325_v25 = vpop.trf.xlu0 }
 0x5d4   : > { %2407 = vmatmul.mubr.msk.f32.vlgmr.msra.gmra.mrb[12].mxu1 %vm800_vm4, %v1325_v25 }
 0x635   : > { %v1416_v26 = vpop.f32.mrb[8].mxu0 }
 0x636   : > { %1657 = vxpose.xlu0.b32.start.end [1/1] (short) (narrow) %v1416_v26, 16  ;;  %v2387_v27 = vpop.f32.mrb[9].mxu0 }
 0x64b   : > { %v1495_v28 = vpop.f32.mrb[10].mxu1 }
 0x64c   : > { %1689 = vxpose.xlu0.b32.start.end [1/1] (short) (narrow) %v1495_v28, 16  ;;  %v2394_v29 = vpop.f32.mrb[11].mxu1 }
 0x6a3   : > { %v1574_v30 = vpop.f32.mrb[10].mxu0 }
 0x6a4   : > { %1721 = vxpose.xlu0.b32.start.end [1/1] (short) (narrow) %v1574_v30, 16  ;;  %v2401_v31 = vpop.f32.mrb[11].mxu0 }
 0x6a7   : > { %v1653_v32 = vpop.f32.mrb[12].mxu1 }
 0x6a8   : > { %1753 = vxpose.xlu1.b32.start.end [1/1] (short) (narrow) %v1653_v32, 16  ;;  %v2408_v33 = vpop.f32.mrb[13].mxu1 }
 0x6b6   : > { %v1673_v34 = vpop.trf.xlu0 }
 0x6ba   : > { %v1674_v17 = vpop.trf.xlu0 }
 0x6cc   : > { %v1705_v35 = vpop.trf.xlu0 }
 0x6d0   : > { %v1706_v36 = vpop.trf.xlu0 }
 0x724   : > { %v1737_v44 = vpop.trf.xlu0 }
 0x725   : > { %v1785_v47 = vcombine.low %v1673_v34, %v1737_v44  ;;  %v1786_v48 = vcombine.high %v1673_v34, %v1737_v44 }
 0x727   : > { %v1793_v55 = vrot.slane %v1785_v47, %v1792_v46  ;;  %v1800_v56 = vrot.slane %v1786_v48, %v1792_v46 }
 0x728   : > { %v1769_v50 = vpop.trf.xlu1  ;;  %v1738_v53 = vpop.trf.xlu0 }
 0x729   : > { %v1801_v51 = vcombine.low %v1705_v35, %v1769_v50  ;;  %v1802_v52 = vcombine.high %v1705_v35, %v1769_v50  ;;  %v1853_v59 = vcombine.low %v1674_v17, %v1738_v53  ;;  %v1854_v60 = vcombine.high %v1674_v17, %v1738_v53 }
 0x72b   : > { %v1809_v57 = vrot.slane %v1801_v51, %v1792_v46  ;;  %v1816_v58 = vrot.slane %v1802_v52, %v1792_v46  ;;  %v1861_v7 = vrot.slane %v1853_v59, %v1792_v46  ;;  %v1868_v8 = vrot.slane %v1854_v60, %v1792_v46 }
 0x72c   : > { %v1770_v61 = vpop.trf.xlu1 }
 0x72d   : > { %v1817_v62 = vcombine.low %v1793_v55, %v1809_v57  ;;  %v1818_v49 = vcombine.high %v1793_v55, %v1809_v57  ;;  %v1833_v63 = vcombine.low %v1800_v56, %v1816_v58  ;;  %v1834_v0 = vcombine.high %v1800_v56, %v1816_v58 }
 0x72e   : > { %v1869_v1 = vcombine.low %v1706_v36, %v1770_v61  ;;  %v1870_v2 = vcombine.high %v1706_v36, %v1770_v61 }
 0x72f   : > { %v1825_v3 = vrot.slane %v1817_v62, %v3156_v54  ;;  %v1832_v4 = vrot.slane %v1818_v49, %v3156_v54  ;;  %v1841_v5 = vrot.slane %v1833_v63, %v3156_v54  ;;  %v1848_v6 = vrot.slane %v1834_v0, %v3156_v54 }
 0x730   : > { %v1877_v9 = vrot.slane %v1869_v1, %v1792_v46  ;;  %v1884_v10 = vrot.slane %v1870_v2, %v1792_v46 }
 0x731   : > { %v1921_v11 = vcombine.low %v1825_v3, %v1832_v4  ;;  %v2255_v12 = vcombine.high %v1825_v3, %v1832_v4  ;;  %v1937_v14 = vcombine.low %v1841_v5, %v1848_v6  ;;  %v2256_v15 = vcombine.high %v1841_v5, %v1848_v6 }
 0x732   : > { %v1885_v16 = vcombine.low %v1861_v7, %v1877_v9  ;;  %v1886_v18 = vcombine.high %v1861_v7, %v1877_v9  ;;  %v1901_v13 = vcombine.low %v1868_v8, %v1884_v10  ;;  %v1902_v19 = vcombine.high %v1868_v8, %v1884_v10 }
 0x733   : > { %v1928_v20 = vrot.slane %v1921_v11, %v1792_v46  ;;  %v1936_v21 = vrot.slane %v2255_v12, %v1792_v46  ;;  %v1944_v22 = vrot.slane %v1937_v14, %v1792_v46  ;;  %v1952_v23 = vrot.slane %v2256_v15, %v1792_v46 }
 0x734   : > { %v1893_v24 = vrot.slane %v1885_v16, %v3156_v54  ;;  %v1900_v25 = vrot.slane %v1886_v18, %v3156_v54  ;;  %v1909_v26 = vrot.slane %v1901_v13, %v3156_v54  ;;  %v1916_v27 = vrot.slane %v1902_v19, %v3156_v54 }
 0x735   : > { %v1954_v28 = vcombine.high %v1928_v20, %v1936_v21  ;;  %v1970_v29 = vcombine.high %v1944_v22, %v1952_v23  ;;  %v1953_v30 = vcombine.low %v1928_v20, %v1936_v21  ;;  %v1969_v31 = vcombine.low %v1944_v22, %v1952_v23 }
 0x736   : > { %v1989_v32 = vcombine.low %v1893_v24, %v1900_v25  ;;  %v2257_v33 = vcombine.high %v1893_v24, %v1900_v25  ;;  %v2005_v34 = vcombine.low %v1909_v26, %v1916_v27  ;;  %v2258_v17 = vcombine.high %v1909_v26, %v1916_v27 }
 0x737   : > { %v1968_v35 = vrot.slane %v1954_v28, %v3156_v54  ;;  %v1984_v36 = vrot.slane %v1970_v29, %v3156_v54  ;;  %v1961_v37 = vrot.slane %v1953_v30, %v3156_v54  ;;  %v1977_v38 = vrot.slane %v1969_v31, %v3156_v54 }
 0x738   : > { %v1996_v39 = vrot.slane %v1989_v32, %v1792_v46  ;;  %v2004_v40 = vrot.slane %v2257_v33, %v1792_v46  ;;  %v2012_v41 = vrot.slane %v2005_v34, %v1792_v46  ;;  %v2020_v42 = vrot.slane %v2258_v17, %v1792_v46 }
 0x739   : > { %v1987_v43 = vcombine.low %v1968_v35, %v1984_v36  ;;  %v1986_v44 = vcombine.high %v1961_v37, %v1977_v38  ;;  %v1985_v45 = vcombine.low %v1961_v37, %v1977_v38  ;;  %v1988_v60 = vcombine.high %v1968_v35, %v1984_v36 }
 0x73a   : > { %v2022_v47 = vcombine.high %v1996_v39, %v2004_v40  ;;  %v2038_v48 = vcombine.high %v2012_v41, %v2020_v42  ;;  %v2021_v50 = vcombine.low %v1996_v39, %v2004_v40  ;;  %v2037_v51 = vcombine.low %v2012_v41, %v2020_v42 }
 0x73b   : > { %2067 = vrot.lane.b32.xlu1 %v1987_v43, %s2803_s8  ;;  %2059 = vrot.lane.b32.xlu0 %v1986_v44, %s2804_s11 }
 0x73c   : > { %v2036_v52 = vrot.slane %v2022_v47, %v3156_v54  ;;  %v2052_v53 = vrot.slane %v2038_v48, %v3156_v54  ;;  %v2029_v55 = vrot.slane %v2021_v50, %v3156_v54  ;;  %v2045_v46 = vrot.slane %v2037_v51, %v3156_v54 }
 0x73e   : > { %v2056_v56 = vcombine.high %v2036_v52, %v2052_v53  ;;  %v2054_v57 = vcombine.high %v2029_v55, %v2045_v46  ;;  %v2053_v58 = vcombine.low %v2029_v55, %v2045_v46  ;;  %v2055_v59 = vcombine.low %v2036_v52, %v2052_v53 }
 0x740   : > { %2077 = vrot.lane.b32.xlu0 %v2056_v56, %s2805_s10  ;;  %2061 = vrot.lane.b32.xlu1 %v2054_v57, %s2804_s11 }
 0x744   : > { %2069 = vrot.lane.b32.xlu1 %v2055_v59, %s2803_s8 }
 0x748   : > { %2075 = vrot.lane.b32.xlu1 %v1988_v60, %s2805_s10 }
 0x7ad   : > { %v2068_v61 = vpop.permute.xlu1 %2067  ;;  %v2060_v62 = vpop.permute.xlu0 %2059 }
 0x7ae   : > { %v2081_v0 = vsel %vm800_vm4, %v1985_v45, %v2060_v62 }
 0x7af   : > { %v2083_v5 = vsel %vm491_vm3, %v2081_v0, %v2068_v61 }
 0x7b2   : > { %v2062_v49 = vpop.permute.xlu1 %2061  ;;  %v2078_v1 = vpop.permute.xlu0 %2077 }
 0x7b3   : > { %v2082_v54 = vsel %vm800_vm4, %v2053_v58, %v2062_v49 }
 0x7b6   : > { %v2070_v63 = vpop.permute.xlu1 %2069 }
 0x7b7   : > { %v2084_v2 = vsel %vm491_vm3, %v2082_v54, %v2070_v63 }
 0x7b8   : > { %v2087_v3 = vsel %vm2085_vm6, %v2084_v2, %v2078_v1 }
 0x7b9   : > { %2089 = vst.msk [vmem:[%s3047_s26 + $0x8] sm:$0xff] %vm259_vm1, %v2087_v3 }
 0x7ba   : > { %v2076_v4 = vpop.permute.xlu1 %2075 }
 0x7bb   : > { %v2086_v6 = vsel %vm2085_vm6, %v2083_v5, %v2076_v4 }
 0x7bc   : > { %2088 = vst.msk [vmem:[%s3047_s26] sm:$0xff] %vm259_vm1, %v2086_v6 }
 0x7bd   : > { %2699 = shalt.err (!%p2696_p12)
}
 0x7be   : > { %s2700_s26 = scalar_lea.hbm %s3186_s24, 256  ;;  %s2704_s8 = scalar_lea.hbm %s3249_s3, 512 }
 0x7bf   : > { %p2701_p1 = scmp.ne.s32.totalorder %s3186_s24, %s2700_s26  ;;  %p2705_p9 = scmp.lt.u32.totalorder %s3186_s24, %s3249_s3 }
 0x7c0   : > { %p2706_p4 = scmp.lt.u32.totalorder %s2704_s8, %s2700_s26  ;;  %p2708_p6 = scmp.lt.u32.totalorder %s2700_s26, %s3186_s24 }
 0x7c1   : > { %p2702_p2 = pnand %p2701_p1, %p2974_p8 }
 0x7c2   : > { %p2707_p0 = por %p2706_p4, %p2705_p9 }
 0x7c3   : > { %p2703_p5 = pneg %p2702_p2 }
 0x7c4   : > { %p2709_p10 = por %p2708_p6, %p2707_p0 }
 0x7c6   : > { %p2710_p11 = pnand %p2709_p10, %p2703_p5 }
 0x7c8   : > { %2713 = shalt.err (!%p2710_p11)
}
 0x7c9   : > { %s2807_s7 = smov 128  }
 0x7ca   : > { %2465 = dma.vmem_to_hbm [thread:$0]  (%p2974_p8), %s3189_s23, 256, %s3186_s24, %s2091_s16, %s2807_s7, %s2807_s7, %s2804_s11  }
 0x7cb PF: > { %p2487_p13 = scmp.ge.s32.totalorder %s2788_s19, 2  ;;  %s2119_s4 = sand.u32 1, %s2760_s12  }
 0x7cc   : > { %p3275_p3 = scmp.ne.s32.totalorder %s3260_s25, 0  ;;  %s2120_s22 = scalar_lea.sflag [#allocation4], %s2119_s4 }
 0x7ce   : > { %p2479_p7 = pnand %p2487_p13, %p3275_p3 }
 0x7d0   : > { %2755 = dma.done.wait (!%p2479_p7), %s2120_s22, 256  }
 0x7d1   : > { %2757 = vsyncadd (!%p2479_p7), %s2120_s22, 4294967040  ;;  %s20_s19 = sadd.s32 1, %s2788_s19   ;;  %s3276_s12 = smov %s2764_s13 }
 0x7d2   : > { %p17_p12 = scmp.ge.s32.totalorder %s20_s19, 6   ;;  %s3277_s13 = smov %s2768_s14 }
 0x7d3   : > { %s3278_s14 = smov %s2997_s1  ;;  %s3279_s15 = smov %s2780_s17 }
 0x7d4   : > { %s3280_s16 = smov %s2784_s18  ;;  %s3281_s17 = smov %s3284_s29 }
 0x7d5   : > { %s3282_s18 = smov %s3288_s6  ;;  %19 = sbr.rel (!%p17_p12) target bundleno = 10 (0xa), region = 91 }
 0x7dc   :  { %2125 = vsyncpa [#allocation3], 1 }
 0x7dd   :  { %2127 = vsyncpa [#allocation3 + $0x1], 1 }
 0x7de   :  { %2128 = vsyncpa [#allocation6], 1 }
 0x7df   :  { %2129 = vsyncpa [#allocation4], 1 }
 0x7e0   :  { %2131 = vsyncpa [#allocation4 + $0x1], 1 }

</bundles_post_ra>
